<compile_context>
chip_gen: v5e
topology: v5e:2x2
jax: 0.10.0
libtpu: 0.0.40
codegen_flags: <defaults>
</compile_context>

<pallas_src>
import functools

import jax
import jax.numpy as jnp
import numpy as np
from jax.experimental import pallas as pl
from jax.experimental.pallas import tpu as pltpu

_LANE = 128


# ---------------------------------------------------------------------------
# Pallas kernel: one fused 3-layer MLP, batch on the lane axis.
# ---------------------------------------------------------------------------
def _mff_fused_kernel(x_ref, w0_ref, b0_ref, w1_ref, b1_ref, w2_ref, b2_ref,
                      out_ref):
    # x_ref : (in_dim, tm)        activations, batch on lanes
    # w*_ref: (out_feat, in_feat) transposed fused weights (VMEM-resident)
    # b*_ref: (out_feat, 1)       broadcast over lanes
    # out   : (O, tm)             lane-dense store
    mm_dtype = w0_ref.dtype
    xT = x_ref[...].astype(mm_dtype)

    # Hoist bias loads once (avoid re-broadcast per layer expression).
    b0 = b0_ref[...]
    b1 = b1_ref[...]
    b2 = b2_ref[...]

    h = jnp.tanh(jnp.dot(w0_ref[...], xT,
                         preferred_element_type=jnp.float32) + b0)
    h = jnp.tanh(jnp.dot(w1_ref[...], h.astype(mm_dtype),
                         preferred_element_type=jnp.float32) + b1)
    y = jnp.dot(w2_ref[...], h.astype(mm_dtype),
                preferred_element_type=jnp.float32) + b2
    out_ref[...] = y.astype(out_ref.dtype)


def _round_up(v, m):
    return (v + m - 1) // m * m


def _fuse_params_T(params_u, params_v, mm_dtype):
    """Pack two FeedForward param sets into one fused block-diagonal set,
    stored transposed: W as (out_features, in_features), b as (out, 1)."""
    uw0, ub0, uw1, ub1, uw2, ub2 = params_u
    vw0, vb0, vw1, vb1, vw2, vb2 = params_v
    hu, hv = uw0.shape[1], vw0.shape[1]
    ou, ov = uw2.shape[1], vw2.shape[1]
    H, O = hu + hv, ou + ov

    w0t = jnp.concatenate([uw0.T, vw0.T], axis=0).astype(mm_dtype)   # (H, in)
    b0t = jnp.concatenate([ub0, vb0], axis=1).T                      # (H, 1)

    w1t = jnp.zeros((H, H), jnp.float32)
    w1t = w1t.at[:hu, :hu].set(uw1.T).at[hu:, hu:].set(vw1.T)
    w1t = w1t.astype(mm_dtype)                                       # (H, H)
    b1t = jnp.concatenate([ub1, vb1], axis=1).T                      # (H, 1)

    w2t = jnp.zeros((O, H), jnp.float32)
    w2t = w2t.at[:ou, :hu].set(uw2.T).at[ou:, hu:].set(vw2.T)
    w2t = w2t.astype(mm_dtype)                                       # (O, H)
    b2t = jnp.concatenate([ub2, vb2], axis=1).T                      # (O, 1)

    return (w0t, b0t, w1t, b1t, w2t, b2t), H, O


@functools.partial(jax.jit, static_argnames=("tm", "use_bf16_matmul"))
def multi_feed_forward(x, params_u, params_v, tm=None, use_bf16_matmul=False):
    """Runs both FeedForward nets as one fused Pallas kernel.

    Returns concat([net_u(x), net_v(x)], axis=-1), identical to the
    original (un-fused) semantics.
    """
    B, in_dim = x.shape
    mm_dtype = jnp.bfloat16 if use_bf16_matmul else jnp.float32
    (w0, b0, w1, b1, w2, b2), H, O = _fuse_params_T(params_u, params_v,
                                                    mm_dtype)

    # ---- batch tile (lane axis of every block) ----
    if tm is None:
        cap = 8192              # ~6 MiB/step in f32: fits v5e's 16 MiB default
        if B <= _LANE:
            tm = B              # single full-width tile (last dim == full B)
        else:
            # >=2 tiles so v7x's two TensorCores both get work; harmless on
            # 1-TC v5e/v6e.
            tm = min(cap, _round_up(pl.cdiv(B, 2), _LANE))
    n_tiles = pl.cdiv(B, tm)    # ragged tail handled by clamped edge DMAs

    xT = x.T                    # batch-on-lanes: (B, in) -> (in, B)

    def _resident(shape):
        # Full-array block, constant index -> stays VMEM-resident across grid.
        return pl.BlockSpec(shape, lambda i: tuple(0 for _ in shape))

    itemsize = jnp.dtype(mm_dtype).itemsize
    cost = pl.CostEstimate(
        flops=2 * B * (in_dim * H + H * H + H * O),
        transcendentals=2 * B * H,
        bytes_accessed=4 * (B * in_dim + B * O + 2 * H + O)
        + itemsize * (in_dim * H + H * H + H * O),
    )

    outT = pl.pallas_call(
        _mff_fused_kernel,
        out_shape=jax.ShapeDtypeStruct((O, B), jnp.float32),
        grid=(n_tiles,),
        in_specs=[
            pl.BlockSpec((in_dim, tm), lambda i: (0, i)),   # x: tiled on lanes
            _resident(w0.shape), _resident(b0.shape),
            _resident(w1.shape), _resident(b1.shape),
            _resident(w2.shape), _resident(b2.shape),
        ],
        out_specs=pl.BlockSpec((O, tm), lambda i: (0, i)),  # lane-dense output
        compiler_params=pltpu.CompilerParams(
            dimension_semantics=("parallel",),
            vmem_limit_bytes=32 * 1024 * 1024),
        cost_estimate=cost,
    )(xT, w0, b0, w1, b1, w2, b2)

    return outT.T               # (B, out_u + out_v) == concat([u(x), v(x)], -1)


# ---------------------------------------------------------------------------
# Deterministic parameter init (PyTorch nn.Linear-style uniform bounds).
# ---------------------------------------------------------------------------
def _init_ffn(key, in_dim, hidden, out_dim):
    """Returns (W0,b0,W1,b1,W2,b2) with W stored as (in, out), b as (1, out)."""
    dims = [(in_dim, hidden), (hidden, hidden), (hidden, out_dim)]
    params = []
    for (fan_in, fan_out) in dims:
        key, kw, kb = jax.random.split(key, 3)
        bound = 1.0 / np.sqrt(fan_in)
        W = jax.random.uniform(kw, (fan_in, fan_out), jnp.float32,
                               minval=-bound, maxval=bound)
        b = jax.random.uniform(kb, (1, fan_out), jnp.float32,
                               minval=-bound, maxval=bound)
        params += [W, b]
    return tuple(params), key


def _reference(x, params_u, params_v):
    def mlp(p):
        w0, b0, w1, b1, w2, b2 = p
        h = jnp.tanh(x @ w0 + b0)
        h = jnp.tanh(h @ w1 + b1)
        return h @ w2 + b2
    return jnp.concatenate([mlp(params_u), mlp(params_v)], axis=-1)


if __name__ == "__main__":
    key = jax.random.PRNGKey(0)

    # ffn_dict = {'uu': dict(input_dimensions=4, output_dimensions=1,
    #                        inner_size=32, n_layers=2),
    #             'vv': dict(input_dimensions=4, output_dimensions=1,
    #                        inner_size=32, n_layers=2)}
    batch, in_dim, hidden, out_dim = 8, 4, 32, 1

    key, kx = jax.random.split(key)
    x = jax.random.normal(kx, (batch, in_dim), jnp.float32)

    params_u, key = _init_ffn(key, in_dim, hidden, out_dim)
    params_v, key = _init_ffn(key, in_dim, hidden, out_dim)

    out = multi_feed_forward(x, params_u, params_v)
    jax.block_until_ready(out)

    ref = _reference(x, params_u, params_v)
    np.testing.assert_allclose(np.asarray(out), np.asarray(ref),
                               rtol=1e-5, atol=1e-5)

    print("KERNEL_OK")
</pallas_src>

<mosaic_0001>
module attributes {stable_mosaic.version = 11 : i64} {
  func.func @_mff_fused_kernel(%arg0: i32, %arg1: memref<4x8xf32, #tpu.memory_space<vmem>>, %arg2: memref<64x4xf32, #tpu.memory_space<vmem>>, %arg3: memref<64x1xf32, #tpu.memory_space<vmem>>, %arg4: memref<64x64xf32, #tpu.memory_space<vmem>>, %arg5: memref<64x1xf32, #tpu.memory_space<vmem>>, %arg6: memref<2x64xf32, #tpu.memory_space<vmem>>, %arg7: memref<2x1xf32, #tpu.memory_space<vmem>>, %arg8: memref<2x8xf32, #tpu.memory_space<vmem>>) attributes {dimension_semantics = [#tpu.dimension_semantics<parallel>], iteration_bounds = array<i64: 1>, scalar_prefetch = 0 : i64, scratch_operands = 0 : i64, tpu.core_type = #tpu.core_type<tc>, window_params = [{transform_indices = @transform_0, window_bounds = array<i64: 4, 8>}, {pipeline_mode = #tpu.pipeline_mode<synchronous>, transform_indices = @transform_1, window_bounds = array<i64: 64, 4>}, {pipeline_mode = #tpu.pipeline_mode<synchronous>, transform_indices = @transform_2, window_bounds = array<i64: 64, 1>}, {pipeline_mode = #tpu.pipeline_mode<synchronous>, transform_indices = @transform_3, window_bounds = array<i64: 64, 64>}, {pipeline_mode = #tpu.pipeline_mode<synchronous>, transform_indices = @transform_4, window_bounds = array<i64: 64, 1>}, {pipeline_mode = #tpu.pipeline_mode<synchronous>, transform_indices = @transform_5, window_bounds = array<i64: 2, 64>}, {pipeline_mode = #tpu.pipeline_mode<synchronous>, transform_indices = @transform_6, window_bounds = array<i64: 2, 1>}, {transform_indices = @transform_7, window_bounds = array<i64: 2, 8>}]} {
    %c0 = arith.constant 0 : index
    %c0_0 = arith.constant 0 : index
    %0 = vector.load %arg1[%c0, %c0_0] : memref<4x8xf32, #tpu.memory_space<vmem>>, vector<4x8xf32>
    %c0_1 = arith.constant 0 : index
    %c0_2 = arith.constant 0 : index
    %1 = vector.load %arg3[%c0_1, %c0_2] : memref<64x1xf32, #tpu.memory_space<vmem>>, vector<64x1xf32>
    %c0_3 = arith.constant 0 : index
    %c0_4 = arith.constant 0 : index
    %2 = vector.load %arg5[%c0_3, %c0_4] : memref<64x1xf32, #tpu.memory_space<vmem>>, vector<64x1xf32>
    %c0_5 = arith.constant 0 : index
    %c0_6 = arith.constant 0 : index
    %3 = vector.load %arg7[%c0_5, %c0_6] : memref<2x1xf32, #tpu.memory_space<vmem>>, vector<2x1xf32>
    %c0_7 = arith.constant 0 : index
    %c0_8 = arith.constant 0 : index
    %4 = vector.load %arg2[%c0_7, %c0_8] : memref<64x4xf32, #tpu.memory_space<vmem>>, vector<64x4xf32>
    %cst = arith.constant dense<0.000000e+00> : vector<64x8xf32>
    %5 = tpu.matmul %4, %0, %cst {dimension_numbers = #tpu.dot_dimension_numbers<[1], [0], [0], [1], [0, 0, 1, 1], [], []>} : vector<64x4xf32>, vector<4x8xf32>, vector<64x8xf32> -> vector<64x8xf32>
    %6 = vector.broadcast %1 : vector<64x1xf32> to vector<64x8xf32>
    %7 = arith.addf %5, %6 : vector<64x8xf32>
    %8 = math.tanh %7 : vector<64x8xf32>
    %c0_9 = arith.constant 0 : index
    %c0_10 = arith.constant 0 : index
    %9 = vector.load %arg4[%c0_9, %c0_10] : memref<64x64xf32, #tpu.memory_space<vmem>>, vector<64x64xf32>
    %cst_11 = arith.constant dense<0.000000e+00> : vector<64x8xf32>
    %10 = tpu.matmul %9, %8, %cst_11 {dimension_numbers = #tpu.dot_dimension_numbers<[1], [0], [0], [1], [0, 0, 1, 1], [], []>} : vector<64x64xf32>, vector<64x8xf32>, vector<64x8xf32> -> vector<64x8xf32>
    %11 = vector.broadcast %2 : vector<64x1xf32> to vector<64x8xf32>
    %12 = arith.addf %10, %11 : vector<64x8xf32>
    %13 = math.tanh %12 : vector<64x8xf32>
    %c0_12 = arith.constant 0 : index
    %c0_13 = arith.constant 0 : index
    %14 = vector.load %arg6[%c0_12, %c0_13] : memref<2x64xf32, #tpu.memory_space<vmem>>, vector<2x64xf32>
    %cst_14 = arith.constant dense<0.000000e+00> : vector<2x8xf32>
    %15 = tpu.matmul %14, %13, %cst_14 {dimension_numbers = #tpu.dot_dimension_numbers<[1], [0], [0], [1], [0, 0, 1, 1], [], []>} : vector<2x64xf32>, vector<64x8xf32>, vector<2x8xf32> -> vector<2x8xf32>
    %16 = vector.broadcast %3 : vector<2x1xf32> to vector<2x8xf32>
    %17 = arith.addf %15, %16 : vector<2x8xf32>
    %c0_15 = arith.constant 0 : index
    %c0_16 = arith.constant 0 : index
    %18 = vector.load %arg8[%c0_15, %c0_16] : memref<2x8xf32, #tpu.memory_space<vmem>>, vector<2x8xf32>
    tpu.vector_store %arg8[%c0_15, %c0_16], %17 {strides = array<i32>} : memref<2x8xf32, #tpu.memory_space<vmem>>, vector<2x8xf32>,
    return
  }
  func.func @transform_0(%arg0: i32) -> (i32, i32) {
    %c0_i32 = arith.constant 0 : i32
    %c0_i32_0 = arith.constant 0 : i32
    return %c0_i32, %arg0 : i32, i32
  }
  func.func @transform_1(%arg0: i32) -> (i32, i32) {
    %c0_i32 = arith.constant 0 : i32
    %c0_i32_0 = arith.constant 0 : i32
    %c0_i32_1 = arith.constant 0 : i32
    return %c0_i32, %c0_i32_0 : i32, i32
  }
  func.func @transform_2(%arg0: i32) -> (i32, i32) {
    %c0_i32 = arith.constant 0 : i32
    %c0_i32_0 = arith.constant 0 : i32
    %c0_i32_1 = arith.constant 0 : i32
    return %c0_i32, %c0_i32_0 : i32, i32
  }
  func.func @transform_3(%arg0: i32) -> (i32, i32) {
    %c0_i32 = arith.constant 0 : i32
    %c0_i32_0 = arith.constant 0 : i32
    %c0_i32_1 = arith.constant 0 : i32
    return %c0_i32, %c0_i32_0 : i32, i32
  }
  func.func @transform_4(%arg0: i32) -> (i32, i32) {
    %c0_i32 = arith.constant 0 : i32
    %c0_i32_0 = arith.constant 0 : i32
    %c0_i32_1 = arith.constant 0 : i32
    return %c0_i32, %c0_i32_0 : i32, i32
  }
  func.func @transform_5(%arg0: i32) -> (i32, i32) {
    %c0_i32 = arith.constant 0 : i32
    %c0_i32_0 = arith.constant 0 : i32
    %c0_i32_1 = arith.constant 0 : i32
    return %c0_i32, %c0_i32_0 : i32, i32
  }
  func.func @transform_6(%arg0: i32) -> (i32, i32) {
    %c0_i32 = arith.constant 0 : i32
    %c0_i32_0 = arith.constant 0 : i32
    %c0_i32_1 = arith.constant 0 : i32
    return %c0_i32, %c0_i32_0 : i32, i32
  }
  func.func @transform_7(%arg0: i32) -> (i32, i32) {
    %c0_i32 = arith.constant 0 : i32
    %c0_i32_0 = arith.constant 0 : i32
    return %c0_i32, %arg0 : i32, i32
  }
}

</mosaic_0001>

<bundles_post_ra>
// kernel: multi_feed_forward.1
= control target key start
LH: loop header
LB: loop body
LE: loop exit
PB: predicated region body
PF: predicated region fallthrough
CT: control target
= control target key end

     0   :  { %vm118_vm0 = vcmask 1043456   ;;  %v430_v3 = vmov 0   ;;  %vm93_vm1 = vcmask 31744   ;;  %s597_s0 = inlined_call_operand.vmem [shape: f32[4,8], index: 0, kind: input, shape index: {}]   ;;  %s598_s1 = inlined_call_operand.vmem [shape: f32[64,4], index: 1, kind: input, shape index: {}]   ;;  %s599_s2 = inlined_call_operand.vmem [shape: f32[64,1], index: 2, kind: input, shape index: {}]   ;;  %s600_s3 = inlined_call_operand.vmem [shape: f32[64,64], index: 3, kind: input, shape index: {}]   ;;  %s601_s4 = inlined_call_operand.vmem [shape: f32[64,1], index: 4, kind: input, shape index: {}]   ;;  %s602_s5 = inlined_call_operand.vmem [shape: f32[2,64], index: 5, kind: input, shape index: {}]   ;;  %s603_s6 = inlined_call_operand.vmem [shape: f32[2,1], index: 6, kind: input, shape index: {}]   ;;  %s604_s7 = inlined_call_operand.hbm [shape: f32[2,8], index: 7, kind: output, shape index: {}]  }
   0x1   :  { %v27_v0 = vld [vmem:[%s597_s0] sm:$0xf]  ;;  %v33_v1 = vld [vmem:[%s599_s2 + $0x28] sm:$0xff]  ;;  %370 = vset.pattern.permute.xlu1 %v430_v3  ;;  %v35_v4 = vld [vmem:[%s599_s2 + $0x38] sm:$0xff]  ;;  %369 = vset.pattern.permute.xlu0 %v430_v3 }
   0x2   :  { %v45_v2 = vld [vmem:[%s598_s1] sm:$0xff]  ;;  %340 = vmatpush.msk.msra.mxu0 %vm118_vm0, %v27_v0  ;;  %80 = vperm.xlu1 %370, %v33_v1   ;;  %v51_v5 = vld [vmem:[%s598_s1 + $0x30] sm:$0xff] }
   0x3   :  { %341 = vmatmul.msk.f32.vlgmr.msra.gmra.mxu0 %vm93_vm1, %v45_v2  ;;  %90 = vperm.xlu0 %369, %v35_v4  }
   0x4   :  { %358 = vmatpush.msk.msra.mxu2 %vm118_vm0, %v27_v0  ;;  %371 = vset.pattern.permute.xlu2 %v430_v3 }
   0x5   :  { %347 = vmatmul.msk.f32.vlgmr.msra.gmra.mxu2 %vm93_vm1, %v51_v5 }
   0x6   :  { %12 = vsyncpa [#allocation3], 0  ;;  %v32_v6 = vld [vmem:[%s599_s2 + $0x20] sm:$0xff]  ;;  %v46_v7 = vld [vmem:[%s598_s1 + $0x8] sm:$0xff]  ;;  %vm219_vm2 = vcmask 523264   ;;  %s431_s16 = smov [#allocation2]  }
   0x7   :  { %v34_v8 = vld [vmem:[%s599_s2 + $0x30] sm:$0xff]  ;;  %v52_v9 = vld [vmem:[%s598_s1 + $0x38] sm:$0xff]  ;;  %v28_v11 = vld [vmem:[%s599_s2] sm:$0xff]  ;;  %s329_s17 = sshll.u32 %s431_s16, 4  ;;  %s331_s20 = sshll.u32 %s604_s7, 4  ;;  %vm322_vm3 = vcmask 58368   ;;  %s330_s17 = int_to_ptr.vmem [resolvable:$true] %s329_s17  ;;  %s332_s20 = int_to_ptr.hbm [resolvable:$true] %s331_s20 }
   0x8   :  { %v31_v10 = vld [vmem:[%s599_s2 + $0x18] sm:$0xff]  ;;  %v47_v12 = vld [vmem:[%s598_s1 + $0x10] sm:$0xff]  ;;  %v29_v13 = vld [vmem:[%s599_s2 + $0x8] sm:$0xff] }
   0x9   :  { %70 = vperm.xlu2 %371, %v31_v10   ;;  %v30_v14 = vld [vmem:[%s599_s2 + $0x10] sm:$0xff]  ;;  %v41_v15 = vld [vmem:[%s601_s4 + $0x28] sm:$0xff]  ;;  %v48_v16 = vld [vmem:[%s598_s1 + $0x18] sm:$0xff] }
   0xa   :  { %75 = vperm.xlu1 %370, %v32_v6   ;;  %v42_v17 = vld [vmem:[%s601_s4 + $0x30] sm:$0xff]  ;;  %v43_v18 = vld [vmem:[%s601_s4 + $0x38] sm:$0xff]  ;;  %v49_v20 = vld [vmem:[%s598_s1 + $0x20] sm:$0xff] }
   0xb   :  { %342 = vmatmul.msk.f32.gmra.mxu0 %vm93_vm1, %v46_v7  ;;  %85 = vperm.xlu0 %369, %v34_v8   ;;  %v38_v19 = vld [vmem:[%s601_s4 + $0x10] sm:$0xff]  ;;  %v39_v21 = vld [vmem:[%s601_s4 + $0x18] sm:$0xff]  ;;  %v40_v22 = vld [vmem:[%s601_s4 + $0x20] sm:$0xff] }
   0xc   :  { %v44_v23 = vld [vmem:[%s603_s6] sm:$0x3]  ;;  %v50_v24 = vld [vmem:[%s598_s1 + $0x28] sm:$0xff]  ;;  %v173_v63 = vld [vmem:[%s600_s3 + $0x10] sm:$0xff] }
   0xd   :  { %348 = vmatmul.msk.f32.gmra.mxu2 %vm93_vm1, %v52_v9  ;;  %v36_v25 = vld [vmem:[%s601_s4] sm:$0xff]  ;;  %v37_v26 = vld [vmem:[%s601_s4 + $0x8] sm:$0xff]  ;;  %v177_v0 = vld [vmem:[%s600_s3 + $0x30] sm:$0xff] }
   0xe   :  { %v171_v58 = vld [vmem:[%s600_s3] sm:$0xff]  ;;  %v172_v61 = vld [vmem:[%s600_s3 + $0x8] sm:$0xff]  ;;  %v174_v1 = vld [vmem:[%s600_s3 + $0x18] sm:$0xff] }
   0xf   :  { %v175_v59 = vld [vmem:[%s600_s3 + $0x20] sm:$0xff]  ;;  %v176_v62 = vld [vmem:[%s600_s3 + $0x28] sm:$0xff]  ;;  %v178_v2 = vld [vmem:[%s600_s3 + $0x38] sm:$0xff] }
  0x11   :  { %65 = vperm.xlu2 %371, %v30_v14  }
  0x12   :  { %55 = vperm.xlu1 %370, %v28_v11  }
  0x13   :  { %343 = vmatmul.msk.f32.gmra.mxu0 %vm93_vm1, %v47_v12  ;;  %60 = vperm.xlu0 %369, %v29_v13  }
  0x19   :  { %216 = vperm.xlu2 %371, %v43_v18  }
  0x1a   :  { %206 = vperm.xlu1 %370, %v41_v15  }
  0x1b   :  { %344 = vmatmul.msk.f32.gmra.mxu0 %vm93_vm1, %v48_v16  ;;  %211 = vperm.xlu0 %369, %v42_v17  }
  0x21   :  { %201 = vperm.xlu2 %371, %v40_v22  }
  0x22   :  { %191 = vperm.xlu1 %370, %v38_v19  }
  0x23   :  { %345 = vmatmul.msk.f32.gmra.mxu0 %vm93_vm1, %v49_v20  ;;  %196 = vperm.xlu0 %369, %v39_v21  }
  0x29   :  { %186 = vperm.xlu2 %371, %v37_v26  }
  0x2a   :  { %296 = vperm.xlu1 %370, %v44_v23  }
  0x2b   :  { %346 = vmatmul.msk.f32.gmra.mxu0 %vm93_vm1, %v50_v24  ;;  %181 = vperm.xlu0 %369, %v36_v25  }
  0x63   :  { %v71_v41 = vpop.permute.xlu2 %70 }
  0x6b   :  { %v66_v47 = vpop.permute.xlu2 %65 }
  0x73   :  { %v217_v7 = vpop.permute.xlu2 %216 }
  0x74   :  { %v81_v39 = vpop.permute.xlu1 %80 }
  0x75   :  { %v91_v28 = vpop.permute.xlu0 %90 }
  0x7b   :  { %v202_v12 = vpop.permute.xlu2 %201 }
  0x7c   :  { %v76_v42 = vpop.permute.xlu1 %75 }
  0x7d   :  { %v86_v31 = vpop.permute.xlu0 %85 }
  0x80   :  { %v139_v27 = vpop.f32.mrf.mxu0 }
  0x83   :  { %v187_v24 = vpop.permute.xlu2 %186 }
  0x84   :  { %v56_v49 = vpop.permute.xlu1 %55 }
  0x85   :  { %v61_v50 = vpop.permute.xlu0 %60  ;;  %v140_v53 = vadd.f32 %v139_v27, %v56_v49 }
  0x88   :  { %v142_v29 = vpop.f32.mrf.mxu0  ;;  %v157_v30 = vpop.f32.mrf.mxu2 }
  0x89   :  { %v158_v32 = vadd.f32 %v157_v30, %v86_v31  ;;  %v143_v51 = vadd.f32 %v142_v29, %v61_v50 }
  0x8b   :  { %372 = vtanh.f32 %v158_v32 }
  0x8c   :  { %v207_v11 = vpop.permute.xlu1 %206 }
  0x8d   :  { %v212_v8 = vpop.permute.xlu0 %211 }
  0x90   :  { %v145_v33 = vpop.f32.mrf.mxu0  ;;  %v160_v34 = vpop.f32.mrf.mxu2 }
  0x91   :  { %v161_v35 = vadd.f32 %v160_v34, %v91_v28  ;;  %v373_v37 = vpop.eup %372  ;;  %v146_v48 = vadd.f32 %v145_v33, %v66_v47  ;;  %v293_v34 = vld [vmem:[%s602_s5] sm:$0x3] }
  0x93   :  { %374 = vtanh.f32 %v161_v35 }
  0x94   :  { %v192_v21 = vpop.permute.xlu1 %191 }
  0x95   :  { %v197_v16 = vpop.permute.xlu0 %196 }
  0x98   :  { %v148_v36 = vpop.f32.mrf.mxu0 }
  0x99   :  { %v375_v38 = vpop.eup %374  ;;  %v149_v46 = vadd.f32 %v148_v36, %v71_v41 }
  0x9a   :  { %252 = vmatpush.msra.mxu1 %v375_v38  ;;  %359 = vmatpush.msra.mxu3 %v375_v38 }
  0x9c   :  { %253 = vmatpush.msra.mxu1 %v373_v37  ;;  %360 = vmatpush.msra.mxu3 %v373_v37  ;;  %v297_v36 = vpop.permute.xlu1 %296 }
  0x9d   :  { %v182_v27 = vpop.permute.xlu0 %181 }
  0xa0   :  { %v151_v40 = vpop.f32.mrf.mxu0 }
  0xa1   :  { %v152_v44 = vadd.f32 %v151_v40, %v76_v42 }
  0xa8   :  { %v154_v43 = vpop.f32.mrf.mxu0 }
  0xa9   :  { %v155_v45 = vadd.f32 %v154_v43, %v81_v39 }
  0xab   :  { %376 = vtanh.f32 %v155_v45 }
  0xac   :  { %378 = vtanh.f32 %v152_v44 }
  0xad   :  { %380 = vtanh.f32 %v149_v46 }
  0xae   :  { %382 = vtanh.f32 %v146_v48 }
  0xaf   :  { %384 = vtanh.f32 %v143_v51 }
  0xb0   :  { %386 = vtanh.f32 %v140_v53 }
  0xb1   :  { %v377_v52 = vpop.eup %376 }
  0xb2   :  { %254 = vmatpush.msra.mxu1 %v377_v52  ;;  %361 = vmatpush.msra.mxu3 %v377_v52  ;;  %v379_v54 = vpop.eup %378 }
  0xb3   :  { %v381_v55 = vpop.eup %380 }
  0xb4   :  { %255 = vmatpush.msra.mxu1 %v379_v54  ;;  %362 = vmatpush.msra.mxu3 %v379_v54  ;;  %v383_v56 = vpop.eup %382 }
  0xb5   :  { %v385_v57 = vpop.eup %384 }
  0xb6   :  { %256 = vmatpush.msra.mxu1 %v381_v55  ;;  %363 = vmatpush.msra.mxu3 %v381_v55  ;;  %v387_v60 = vpop.eup %386 }
  0xb8   :  { %257 = vmatpush.msra.mxu1 %v383_v56  ;;  %364 = vmatpush.msra.mxu3 %v383_v56 }
  0xba   :  { %258 = vmatpush.msra.mxu1 %v385_v57  ;;  %365 = vmatpush.msra.mxu3 %v385_v57 }
  0xbc   :  { %259 = vmatpush.msra.mxu1 %v387_v60  ;;  %366 = vmatpush.msra.mxu3 %v387_v60 }
  0xbd   :  { %349 = vmatmul.msk.f32.vlgmr.msra.gmra.mxu1 %vm219_vm2, %v171_v58  ;;  %353 = vmatmul.msk.f32.vlgmr.msra.gmra.mxu3 %vm219_vm2, %v175_v59 }
  0xc5   :  { %350 = vmatmul.msk.f32.gmra.mxu1 %vm219_vm2, %v172_v61  ;;  %354 = vmatmul.msk.f32.gmra.mxu3 %vm219_vm2, %v176_v62 }
  0xcd   :  { %351 = vmatmul.msk.f32.gmra.mxu1 %vm219_vm2, %v173_v63  ;;  %355 = vmatmul.msk.f32.gmra.mxu3 %vm219_vm2, %v177_v0 }
  0xd5   :  { %352 = vmatmul.msk.f32.gmra.mxu1 %vm219_vm2, %v174_v1  ;;  %356 = vmatmul.msk.f32.gmra.mxu3 %vm219_vm2, %v178_v2 }
 0x13a   :  { %v261_v3 = vpop.f32.mrf.mxu1 }
 0x13b   :  { %v262_v29 = vadd.f32 %v261_v3, %v182_v27 }
 0x140   :  { %v273_v4 = vpop.f32.mrf.mxu3 }
 0x141   :  { %v274_v19 = vadd.f32 %v273_v4, %v202_v12 }
 0x142   :  { %v264_v5 = vpop.f32.mrf.mxu1 }
 0x143   :  { %v265_v26 = vadd.f32 %v264_v5, %v187_v24 }
 0x148   :  { %v276_v6 = vpop.f32.mrf.mxu3 }
 0x149   :  { %v277_v17 = vadd.f32 %v276_v6, %v207_v11 }
 0x14a   :  { %v267_v10 = vpop.f32.mrf.mxu1 }
 0x14b   :  { %v268_v23 = vadd.f32 %v267_v10, %v192_v21 }
 0x150   :  { %v279_v9 = vpop.f32.mrf.mxu3 }
 0x151   :  { %v280_v14 = vadd.f32 %v279_v9, %v212_v8 }
 0x152   :  { %v270_v18 = vpop.f32.mrf.mxu1 }
 0x153   :  { %v271_v20 = vadd.f32 %v270_v18, %v197_v16 }
 0x158   :  { %v282_v13 = vpop.f32.mrf.mxu3 }
 0x159   :  { %v283_v15 = vadd.f32 %v282_v13, %v217_v7 }
 0x15b   :  { %388 = vtanh.f32 %v283_v15 }
 0x15c   :  { %390 = vtanh.f32 %v280_v14 }
 0x15d   :  { %392 = vtanh.f32 %v277_v17 }
 0x15e   :  { %394 = vtanh.f32 %v274_v19 }
 0x15f   :  { %396 = vtanh.f32 %v271_v20 }
 0x160   :  { %398 = vtanh.f32 %v268_v23 }
 0x161   :  { %v389_v22 = vpop.eup %388  ;;  %400 = vtanh.f32 %v265_v26 }
 0x162   :  { %310 = vmatpush.msrb.mxu2 %v389_v22  ;;  %v391_v25 = vpop.eup %390  ;;  %402 = vtanh.f32 %v262_v29 }
 0x163   :  { %v393_v28 = vpop.eup %392 }
 0x164   :  { %311 = vmatpush.msrb.mxu2 %v391_v25  ;;  %v395_v30 = vpop.eup %394 }
 0x165   :  { %v397_v31 = vpop.eup %396 }
 0x166   :  { %312 = vmatpush.msrb.mxu2 %v393_v28  ;;  %v399_v32 = vpop.eup %398 }
 0x167   :  { %v401_v33 = vpop.eup %400 }
 0x168   :  { %313 = vmatpush.msrb.mxu2 %v395_v30  ;;  %v403_v35 = vpop.eup %402 }
 0x16a   :  { %314 = vmatpush.msrb.mxu2 %v397_v31 }
 0x16c   :  { %315 = vmatpush.msrb.mxu2 %v399_v32 }
 0x16e   :  { %316 = vmatpush.msrb.mxu2 %v401_v33 }
 0x170   :  { %317 = vmatpush.msrb.mxu2 %v403_v35 }
 0x171   :  { %357 = vmatmul.msk.f32.vlgmr.msrb.gmra.mxu2 %vm219_vm2, %v293_v34 }
 0x1f4   :  { %v319_v37 = vpop.f32.mrf.mxu2 }
 0x1f5   :  { %v320_v38 = vadd.f32 %v319_v37, %v297_v36 }
 0x1f7   :  { %323 = vst.msk [vmem:[#allocation2] sm:$0x3] %vm322_vm3, %v320_v38 }
 0x1f8   :  { %334 = dma.vmem_to_hbm [thread:$0]  %s330_s17, 32, %s332_s20, [#allocation3]  }
 0x1f9   :  { %428 = dma.done.wait [#allocation3], 32  }
 0x1fa   :  { %429 = vsyncadd [#allocation3], 4294967264 }
 0x1fb   :  { %339 = vsyncpa [#allocation3], 1 }

</bundles_post_ra>
